<compile_context>
chip_gen: v7x
topology: tpu7x:2x2x1
jax: 0.10.0
libtpu: 0.0.40
codegen_flags: <defaults>
</compile_context>

<pallas_src>
import functools

import jax
import jax.numpy as jnp
from jax import lax
from jax.experimental import pallas as pl
from jax.experimental.pallas import tpu as pltpu


def _pick_tile(extent, max_tile, align):
    """Largest legal block size: a multiple of `align`, or the full extent."""
    if extent >= max_tile:
        return max_tile            # max_tile is a multiple of align
    if extent % align == 0:
        return extent              # single full block
    aligned = (extent // align) * align
    return aligned if aligned >= align else extent   # full-dim block if tiny


# ---------------------------------------------------------------------------
# Phase 1: fused gather + fc1:  h[e] = (z[a_e] * z[b_e]) @ W_t + b
#   edge indices live in SMEM (scalar prefetch); z is resident in VMEM;
#   rows are gathered into a VMEM scratch tile, then one MXU matmul per tile.
# ---------------------------------------------------------------------------
def _fc1_gather_kernel(eidx_ref, z_ref, wt_ref, b_ref, h_ref, x_ref,
                       *, num_edges, tile):
    base = pl.program_id(0) * tile

    def gather_row(r, carry):
        # Clamp so ragged last tiles never index SMEM / z out of bounds;
        # the duplicated rows land in masked (OOB) output rows.
        e = jnp.minimum(base + r, num_edges - 1)
        a = eidx_ref[e]
        b = eidx_ref[num_edges + e]
        x_ref[pl.ds(r, 1), :] = z_ref[pl.ds(a, 1), :] * z_ref[pl.ds(b, 1), :]
        return carry

    lax.fori_loop(0, tile, gather_row, 0, unroll=False)

    h = jnp.dot(x_ref[...], wt_ref[...], preferred_element_type=jnp.float32)
    h_ref[...] = h + b_ref[...]


# ---------------------------------------------------------------------------
# Phase 2: out[i, j] tile = h_i @ h_j.T  (contraction on last dims, MXU-native)
# ---------------------------------------------------------------------------
def _gram_kernel(hi_ref, hj_ref, out_ref, *, apply_sigmoid):
    s = lax.dot_general(
        hi_ref[...], hj_ref[...],
        dimension_numbers=(((1,), (1,)), ((), ())),
        preferred_element_type=jnp.float32,
    )                                                   # [TM, TN]
    if apply_sigmoid:
        # single EUP transcendental per element; never produces inf.
        s = 0.5 * jnp.tanh(0.5 * s) + 0.5
    out_ref[...] = s.astype(out_ref.dtype)


def simple_linear_decoder_forward(z, edge_index, weight, bias, *, sigmoid=True,
                                  tile_rows=512, tile_out=1024,
                                  out_dtype=jnp.float32):
    """Pallas implementation of SimpleLinearDecoder.forward (== decode).

    z:          [N, H] float32
    edge_index: [2, E] int32
    weight:     [D, H] float32 (fc1.weight, PyTorch layout)
    bias:       [D]    float32 (fc1.bias)
    returns:    [E, E] out_dtype
    """
    N, H = z.shape
    D = weight.shape[0]
    E = edge_index.shape[1]

    # TODO(synk): if z ([N, H]) is too large for VMEM, switch the fused gather
    # to a manual per-row DMA gather from HBM (memory_space=pl.ANY) instead of
    # keeping z resident.
    eidx = edge_index.astype(jnp.int32).reshape(2 * E)   # flat, SMEM-friendly
    wt = weight.T                                        # [H, D], no in-kernel .T
    b2d = bias.reshape(1, D)

    # --- phase 1: fused gather + fc1, tiled over E rows ----------------------
    T1 = _pick_tile(E, tile_rows, 8)
    fc1 = functools.partial(_fc1_gather_kernel, num_edges=E, tile=T1)
    h = pl.pallas_call(
        fc1,
        out_shape=jax.ShapeDtypeStruct((E, D), jnp.float32),
        grid_spec=pltpu.PrefetchScalarGridSpec(
            num_scalar_prefetch=1,
            grid=(pl.cdiv(E, T1),),
            in_specs=[
                pl.BlockSpec((N, H), lambda i, eidx_ref: (0, 0)),  # z (resident)
                pl.BlockSpec((H, D), lambda i, eidx_ref: (0, 0)),  # W^T
                pl.BlockSpec((1, D), lambda i, eidx_ref: (0, 0)),  # bias
            ],
            out_specs=pl.BlockSpec((T1, D), lambda i, eidx_ref: (i, 0)),
            scratch_shapes=[pltpu.VMEM((T1, H), jnp.float32)],
        ),
        compiler_params=pltpu.CompilerParams(
            dimension_semantics=("parallel",),
            vmem_limit_bytes=40 * 1024 * 1024),
        cost_estimate=pl.CostEstimate(
            flops=2 * E * H * D + E * H,
            transcendentals=0,
            bytes_accessed=4 * (N * H + H * D + D + E * D) + 4 * 2 * E),
    )(eidx, z, wt, b2d)

    # --- phase 2: tiled, lane-dense Gram over the exact E x E output ---------
    TM = _pick_tile(E, tile_out, 8)
    TN = _pick_tile(E, tile_out, 128)
    nbi, nbj = pl.cdiv(E, TM), pl.cdiv(E, TN)
    gram = functools.partial(_gram_kernel, apply_sigmoid=sigmoid)
    out = pl.pallas_call(
        gram,
        out_shape=jax.ShapeDtypeStruct((E, E), out_dtype),
        grid=(nbi, nbj),
        in_specs=[
            pl.BlockSpec((TM, D), lambda i, j: (i, 0)),
            pl.BlockSpec((TN, D), lambda i, j: (j, 0)),
        ],
        out_specs=pl.BlockSpec((TM, TN), lambda i, j: (i, j)),
        compiler_params=pltpu.CompilerParams(
            dimension_semantics=("parallel", "parallel"),
            vmem_limit_bytes=40 * 1024 * 1024),
        cost_estimate=pl.CostEstimate(
            flops=2 * E * E * D,
            transcendentals=(E * E if sigmoid else 0),
            bytes_accessed=4 * (E * E + E * D * (nbi + nbj))),
    )(h, h)

    return out


def reference_forward(z, edge_index, weight, bias, *, sigmoid=True):
    zz = z[edge_index[0]] * z[edge_index[1]]
    h = zz @ weight.T + bias
    s = h @ h.T
    return jax.nn.sigmoid(s) if sigmoid else s


if __name__ == "__main__":
    # Module defaults: hidden_dim=128, input_dim=8; small N / E.
    N, H, D, E = 16, 128, 8, 8

    key = jax.random.PRNGKey(0)
    kz, kw, kb, ke = jax.random.split(key, 4)

    z = jax.random.normal(kz, (N, H), dtype=jnp.float32)
    bound = 1.0 / (H ** 0.5)
    weight = jax.random.uniform(kw, (D, H), minval=-bound, maxval=bound,
                                dtype=jnp.float32)
    bias = jax.random.uniform(kb, (D,), minval=-bound, maxval=bound,
                              dtype=jnp.float32)
    edge_index = jax.random.randint(ke, (2, E), 0, N, dtype=jnp.int32)

    # sigmoid=False path (pure matmul chain)
    out_lin = simple_linear_decoder_forward(z, edge_index, weight, bias,
                                            sigmoid=False)
    out_lin = jax.block_until_ready(out_lin)
    ref_lin = reference_forward(z, edge_index, weight, bias, sigmoid=False)
    assert out_lin.shape == (E, E)
    assert jnp.allclose(out_lin, ref_lin, atol=1e-4, rtol=1e-4), \
        "mismatch vs reference (sigmoid=False)"

    # sigmoid=True path (single-tanh sigmoid; matches jax.nn.sigmoid closely)
    out_sig = simple_linear_decoder_forward(z, edge_index, weight, bias,
                                            sigmoid=True)
    out_sig = jax.block_until_ready(out_sig)
    ref_sig = reference_forward(z, edge_index, weight, bias, sigmoid=True)
    assert out_sig.shape == (E, E)
    assert jnp.allclose(out_sig, ref_sig, atol=1e-4, rtol=1e-4), \
        "mismatch vs reference (sigmoid=True)"

    print("KERNEL_OK")
</pallas_src>

<mosaic_0001>
module attributes {stable_mosaic.version = 11 : i64} {
  func.func @_fc1_gather_kernel(%arg0: i32, %arg1: memref<16xi32, #tpu.memory_space<smem>>, %arg2: memref<16x128xf32, #tpu.memory_space<vmem>>, %arg3: memref<128x8xf32, #tpu.memory_space<vmem>>, %arg4: memref<1x8xf32, #tpu.memory_space<vmem>>, %arg5: memref<8x8xf32, #tpu.memory_space<vmem>>, %arg6: memref<8x128xf32, #tpu.memory_space<vmem>>) attributes {dimension_semantics = [#tpu.dimension_semantics<parallel>], iteration_bounds = array<i64: 1>, scalar_prefetch = 1 : i64, scratch_operands = 1 : i64, tpu.core_type = #tpu.core_type<tc>, window_params = [{pipeline_mode = #tpu.pipeline_mode<synchronous>, transform_indices = @transform_0, window_bounds = array<i64: 16, 128>}, {pipeline_mode = #tpu.pipeline_mode<synchronous>, transform_indices = @transform_1, window_bounds = array<i64: 128, 8>}, {pipeline_mode = #tpu.pipeline_mode<synchronous>, transform_indices = @transform_2, window_bounds = array<i64: 1, 8>}, {transform_indices = @transform_3, window_bounds = array<i64: 8, 8>}]} {
    %c8_i32 = arith.constant 8 : i32
    %0 = arith.muli %arg0, %c8_i32 : i32
    %c0_i32 = arith.constant 0 : i32
    %c8_i32_0 = arith.constant 8 : i32
    %1 = arith.addi %c0_i32, %c8_i32_0 : i32
    %c1_i32 = arith.constant 1 : i32
    scf.for %arg7 = %c0_i32 to %1 step %c1_i32  : i32 {
      %9 = arith.addi %0, %arg7 : i32
      %c7_i32 = arith.constant 7 : i32
      %10 = arith.minsi %9, %c7_i32 : i32
      %11 = arith.index_cast %10 : i32 to index
      %12 = memref.load %arg1[%11] : memref<16xi32, #tpu.memory_space<smem>>
      %c8_i32_9 = arith.constant 8 : i32
      %13 = arith.addi %c8_i32_9, %10 : i32
      %14 = arith.index_cast %13 : i32 to index
      %15 = memref.load %arg1[%14] : memref<16xi32, #tpu.memory_space<smem>>
      %16 = arith.index_cast %12 : i32 to index
      %c0_10 = arith.constant 0 : index
      %17 = vector.load %arg2[%16, %c0_10] : memref<16x128xf32, #tpu.memory_space<vmem>>, vector<1x128xf32>
      %18 = arith.index_cast %15 : i32 to index
      %c0_11 = arith.constant 0 : index
      %19 = vector.load %arg2[%18, %c0_11] : memref<16x128xf32, #tpu.memory_space<vmem>>, vector<1x128xf32>
      %20 = arith.mulf %17, %19 : vector<1x128xf32>
      %21 = arith.index_cast %arg7 : i32 to index
      %c0_12 = arith.constant 0 : index
      %22 = vector.load %arg6[%21, %c0_12] : memref<8x128xf32, #tpu.memory_space<vmem>>, vector<1x128xf32>
      tpu.vector_store %arg6[%21, %c0_12], %20 {strides = array<i32>} : memref<8x128xf32, #tpu.memory_space<vmem>>, vector<1x128xf32>,
    }
    %c8_i32_1 = arith.constant 8 : i32
    %c0 = arith.constant 0 : index
    %c0_2 = arith.constant 0 : index
    %2 = vector.load %arg6[%c0, %c0_2] : memref<8x128xf32, #tpu.memory_space<vmem>>, vector<8x128xf32>
    %c0_3 = arith.constant 0 : index
    %c0_4 = arith.constant 0 : index
    %3 = vector.load %arg3[%c0_3, %c0_4] : memref<128x8xf32, #tpu.memory_space<vmem>>, vector<128x8xf32>
    %cst = arith.constant dense<0.000000e+00> : vector<8x8xf32>
    %4 = tpu.matmul %2, %3, %cst {dimension_numbers = #tpu.dot_dimension_numbers<[1], [0], [0], [1], [0, 0, 1, 1], [], []>} : vector<8x128xf32>, vector<128x8xf32>, vector<8x8xf32> -> vector<8x8xf32>
    %c0_5 = arith.constant 0 : index
    %c0_6 = arith.constant 0 : index
    %5 = vector.load %arg4[%c0_5, %c0_6] : memref<1x8xf32, #tpu.memory_space<vmem>>, vector<1x8xf32>
    %6 = vector.broadcast %5 : vector<1x8xf32> to vector<8x8xf32>
    %7 = arith.addf %4, %6 : vector<8x8xf32>
    %c0_7 = arith.constant 0 : index
    %c0_8 = arith.constant 0 : index
    %8 = vector.load %arg5[%c0_7, %c0_8] : memref<8x8xf32, #tpu.memory_space<vmem>>, vector<8x8xf32>
    tpu.vector_store %arg5[%c0_7, %c0_8], %7 {strides = array<i32>} : memref<8x8xf32, #tpu.memory_space<vmem>>, vector<8x8xf32>,
    return
  }
  func.func @transform_0(%arg0: i32, %arg1: memref<16xi32, #tpu.memory_space<smem>>) -> (i32, i32) {
    %c0_i32 = arith.constant 0 : i32
    %c0_i32_0 = arith.constant 0 : i32
    %c0_i32_1 = arith.constant 0 : i32
    return %c0_i32, %c0_i32_0 : i32, i32
  }
  func.func @transform_1(%arg0: i32, %arg1: memref<16xi32, #tpu.memory_space<smem>>) -> (i32, i32) {
    %c0_i32 = arith.constant 0 : i32
    %c0_i32_0 = arith.constant 0 : i32
    %c0_i32_1 = arith.constant 0 : i32
    return %c0_i32, %c0_i32_0 : i32, i32
  }
  func.func @transform_2(%arg0: i32, %arg1: memref<16xi32, #tpu.memory_space<smem>>) -> (i32, i32) {
    %c0_i32 = arith.constant 0 : i32
    %c0_i32_0 = arith.constant 0 : i32
    %c0_i32_1 = arith.constant 0 : i32
    return %c0_i32, %c0_i32_0 : i32, i32
  }
  func.func @transform_3(%arg0: i32, %arg1: memref<16xi32, #tpu.memory_space<smem>>) -> (i32, i32) {
    %c0_i32 = arith.constant 0 : i32
    %c0_i32_0 = arith.constant 0 : i32
    return %arg0, %c0_i32 : i32, i32
  }
}

</mosaic_0001>

<bundles_post_ra>
// kernel: tpu_custom_call.1
= control target key start
LH: loop header
LB: loop body
LE: loop exit
PB: predicated region body
PF: predicated region fallthrough
CT: control target
= control target key end

     0   :  { %s398_s0 = inlined_call_operand.vmem [shape: s32[16], index: 0, kind: input, shape index: {}]   ;;  %s399_s1 = inlined_call_operand.vmem [shape: f32[16,128], index: 1, kind: input, shape index: {}]   ;;  %s400_s2 = inlined_call_operand.vmem [shape: f32[128,8], index: 2, kind: input, shape index: {}]   ;;  %s401_s3 = inlined_call_operand.vmem [shape: f32[1,8], index: 3, kind: input, shape index: {}]   ;;  %s402_s4 = inlined_call_operand.hbm [shape: f32[8,8], index: 4, kind: output, shape index: {}]  }
   0x1   :  { %s9_s17 = sshll.u32 %s398_s0, 4  ;;  %s10_s17 = int_to_ptr.vmem [resolvable:$true] %s9_s17 }
   0x2   :  { %s250_s18 = scalar_lea.vmem %s10_s17, 16  ;;  %p255_p1 = scmp.lt.s32.totalorder %s10_s17, %s10_s17 }
   0x3   :  { %p251_p0 = scmp.ne.s32.totalorder %s10_s17, %s250_s18  ;;  %p256_p2 = scmp.lt.s32.totalorder %s250_s18, %s250_s18 }
   0x5   :  { %p257_p3 = por %p256_p2, %p255_p1 }
   0x7   :  { %p258_p4 = pnand %p257_p3, %p251_p0 }
   0x9   :  { %261 = shalt.err (!%p258_p4)  }
   0xa   :  { %s296_s19 = smov [#allocation4]  }
   0xb   :  { %12 = dma.vmem_to_smem %s10_s17, 16, %s296_s19, [#allocation3] }
   0xc   :  { %288 = dma.done.wait [#allocation3], 16 }
   0xd   :  { %289 = vsyncadd [#allocation3], 4294967280 }
   0xe   :  { %14 = sfence }
   0xf   :  { %15 = vsyncpa [#allocation6], 0  ;;  %s292_s20 = smov 0  }
  0x10 LB: > { %p30_p5 = scmp.lt.s32.totalorder %s294_s20, 7  ;;  %s40_s30 = scalar_lea.vmem [#allocation2], %s294_s20  ;;  %s294_s20 = sphi %s292_s20, %s28_s20  }
  0x12   : > { %s31_s0 = scalar_select %p30_p5, %s294_s20, 7 }
  0x13   : > { %s28_s20 = sadd.s32 1, %s294_s20  }
  0x14   : > { %s32_s21 = sld [smem:[#allocation4 + %s31_s0]]  ;;  %s33_s22 = sadd.s32 8, %s31_s0 }
  0x15   : > { %s34_s23 = sld [smem:[#allocation4 + %s33_s22]]  ;;  %p25_p6 = scmp.ge.s32.totalorder %s28_s20, 8  }
  0x16   :  { %v43_v3 = vld [vmem:[%s400_s2] sm:$0xff] (%p25_p6)  ;;  %v44_v4 = vld [vmem:[%s400_s2 + $0x8] sm:$0xff] (%p25_p6)  ;;  %v45_v5 = vld [vmem:[%s400_s2 + $0x10] sm:$0xff] (%p25_p6)  ;;  %v297_v6 = vmov (%p25_p6), 0.0|0.0   ;;  %vm298_vm0 = vmmov (%p25_p6), 0   ;;  %v299_v9 = vmov (%p25_p6), 0.0  }
  0x17   :  { %213 = vmatprep.subr.bf16.mxu0 (%p25_p6), %v297_v6  ;;  %v214_v7 = vpack.c.bf16 (%p25_p6), %v44_v4, %v43_v3  ;;  %v46_v8 = vld [vmem:[%s400_s2 + $0x18] sm:$0xff] (%p25_p6)  ;;  %210 = vmatprep.mubr.msk.f32.mxu0 (%p25_p6), %vm298_vm0, %v299_v9  ;;  %v47_v11 = vld [vmem:[%s400_s2 + $0x20] sm:$0xff] (%p25_p6)  ;;  %v48_v12 = vld [vmem:[%s400_s2 + $0x28] sm:$0xff] (%p25_p6)  ;;  %s300_s11 = smov (%p25_p6), [#allocation5]   ;;  %vm136_vm1 = vcmask (%p25_p6), 64512  }
  0x18   :  { %v217_v10 = vpack.c.bf16 (%p25_p6), %v46_v8, %v45_v5  ;;  %v220_v13 = vpack.c.bf16 (%p25_p6), %v48_v12, %v47_v11  ;;  %v49_v14 = vld [vmem:[%s400_s2 + $0x30] sm:$0xff] (%p25_p6)  ;;  %v50_v15 = vld [vmem:[%s400_s2 + $0x38] sm:$0xff] (%p25_p6)  ;;  %v51_v17 = vld [vmem:[%s400_s2 + $0x40] sm:$0xff] (%p25_p6)  ;;  %s144_s12 = sshll.u32 (%p25_p6), %s300_s11, 4  ;;  %s145_s12 = int_to_ptr.vmem [resolvable:$true] %s144_s12 }
  0x19   :  { %27 = sbr.rel (!%p25_p6) target bundleno = 16 (0x10), region = 42  ;;  %215 = vmatpush3.bf16.msra.mxu0 (%p25_p6), %v214_v7  ;;  %v223_v16 = vpack.c.bf16 (%p25_p6), %v50_v15, %v49_v14  ;;  %v52_v18 = vld [vmem:[%s400_s2 + $0x48] sm:$0xff] (%p25_p6)  ;;  %v53_v20 = vld [vmem:[%s400_s2 + $0x50] sm:$0xff] (%p25_p6)  ;;  %v54_v21 = vld [vmem:[%s400_s2 + $0x58] sm:$0xff] (%p25_p6)  ;;  %p267_p8 = scmp.lt.s32.totalorder (%p25_p6), %s145_s12, %s145_s12 }
  0x1a   : > { %s35_s26 = scalar_lea.vmem %s399_s1, %s32_s21  ;;  %216 = vmatprep.subr.bf16.mxu0 (%p25_p6), %v297_v6  ;;  %v226_v19 = vpack.c.bf16 (%p25_p6), %v52_v18, %v51_v17  ;;  %v229_v22 = vpack.c.bf16 (%p25_p6), %v54_v21, %v53_v20  ;;  %v55_v23 = vld [vmem:[%s400_s2 + $0x60] sm:$0xff] (%p25_p6)  ;;  %v56_v24 = vld [vmem:[%s400_s2 + $0x68] sm:$0xff] (%p25_p6)  ;;  %v57_v26 = vld [vmem:[%s400_s2 + $0x70] sm:$0xff] (%p25_p6) }
  0x1b   : > { %v36_v0 = vld [vmem:[%s35_s26] sm:$0x1]  ;;  %s37_s29 = scalar_lea.vmem %s399_s1, %s34_s23  ;;  %v232_v25 = vpack.c.bf16 (%p25_p6), %v56_v24, %v55_v23  ;;  %v58_v27 = vld [vmem:[%s400_s2 + $0x78] sm:$0xff] (%p25_p6)  ;;  %s262_s1 = scalar_lea.vmem (%p25_p6), %s145_s12, 128 }
  0x1c   : > { %v38_v1 = vld [vmem:[%s37_s29] sm:$0x1]  ;;  %v235_v28 = vpack.c.bf16 (%p25_p6), %v58_v27, %v57_v26  ;;  %p263_p7 = scmp.ne.s32.totalorder (%p25_p6), %s145_s12, %s262_s1  ;;  %p268_p9 = scmp.lt.s32.totalorder (%p25_p6), %s262_s1, %s262_s1 }
  0x1d   : > { %v39_v2 = vmul.f32 %v38_v1, %v36_v0  ;;  %218 = vmatpush3.bf16.msra.mxu0 (%p25_p6), %v217_v10  ;;  %v160_v30 = vld [vmem:[%s401_s3] ss:$0 sm:$0xff] (%p25_p6) }
  0x1e   :  { %219 = vmatprep.subr.bf16.mxu0 (%p25_p6), %v297_v6  ;;  %p269_p10 = por (%p25_p6), %p268_p9, %p267_p8 }
  0x1f   : > { %41 = vst [vmem:[%s40_s30] sm:$0x1] %v39_v2 }
  0x20   :  { %p270_p11 = pnand %p269_p10, %p263_p7 }
  0x21   :  { %221 = vmatpush3.bf16.msra.mxu0 %v220_v13 }
  0x22   :  { %222 = vmatprep.subr.bf16.mxu0 %v297_v6 }
  0x25   :  { %224 = vmatpush3.bf16.msra.mxu0 %v223_v16 }
  0x26   :  { %225 = vmatprep.subr.bf16.mxu0 %v297_v6  ;;  %v42_v29 = vld [vmem:[#allocation2] sm:$0xff] }
  0x29   :  { %227 = vmatpush3.bf16.msra.mxu0 %v226_v19 }
  0x2a   :  { %228 = vmatprep.subr.bf16.mxu0 %v297_v6 }
  0x2d   :  { %230 = vmatpush3.bf16.msra.mxu0 %v229_v22 }
  0x2e   :  { %231 = vmatprep.subr.bf16.mxu0 %v297_v6 }
  0x31   :  { %233 = vmatpush3.bf16.msra.mxu0 %v232_v25 }
  0x32   :  { %234 = vmatprep.subr.bf16.mxu0 %v297_v6 }
  0x35   :  { %236 = vmatpush3.bf16.msra.mxu0 %v235_v28 }
  0x38   :  { %211 = vmatmul.mubr.f32.vlgmr.msra.gmra.mrb[0].mxu0 %v42_v29 }
 0x10b   :  { %v132_v31 = vpop.f32.mrb[0].mxu0 }
 0x10c   :  { %v133_v32 = vadd.f32 %v160_v30, %v132_v31  ;;  %v212_v33 = vpop.f32.mrb[1].mxu0 }
 0x10e   :  { %137 = vst.msk [vmem:[#allocation5] sm:$0xff] %vm136_vm1, %v133_v32 }
 0x10f   :  { %273 = shalt.err (!%p270_p11)
}
 0x110   :  { %s274_s14 = scalar_lea.hbm %s402_s4, 128 }
 0x111   :  { %p275_p12 = scmp.ne.s32.totalorder %s402_s4, %s274_s14  ;;  %p278_p13 = scmp.lt.u32.totalorder %s274_s14, %s402_s4 }
 0x113   :  { %p280_p0 = pnand %p278_p13, %p275_p12 }
 0x115   :  { %283 = shalt.err (!%p280_p0)
}
 0x116   :  { %147 = dma.vmem_to_hbm [thread:$0]  %s145_s12, 128, %s402_s4, [#allocation6]  }
 0x117   :  { %290 = dma.done.wait [#allocation6], 128  }
 0x118   :  { %291 = vsyncadd [#allocation6], 4294967168 }
 0x119   :  { %151 = vsyncpa [#allocation6], 1 }

</bundles_post_ra>
